<compile_context>
chip_gen: v6e
topology: v6e:2x2x1
jax: 0.10.0
libtpu: 0.0.40
codegen_flags: <defaults>
</compile_context>

<pallas_src>
import functools

import jax
import jax.numpy as jnp
from jax.experimental import pallas as pl
from jax.experimental.pallas import tpu as pltpu

LN_EPS = 1e-5            # nn.LayerNorm default
_MIB = 1 << 20


def _round_up(x, m):
    return (x + m - 1) // m * m


def _tpu_vmem_capacity_bytes():
    try:
        return int(pltpu.get_tpu_info().vmem_capacity_bytes)
    except Exception:
        return 64 * _MIB          # conservative (v7x per-core); safe on every generation


def _default_vmem_budget():
    cap = _tpu_vmem_capacity_bytes()
    # v5e/v6e (128 MiB) -> ~108 MiB; v7x (64 MiB) -> ~44 MiB.
    return max(32 * _MIB, min(cap - 20 * _MIB, 108 * _MIB))


def _footprint_bytes(tm, tk, k_steps, h_pad, out_itemsize):
    """VMEM footprint with the real buffer counts the specs below will use."""
    w_bufs = 1 if k_steps == 1 else 2            # resident W single-buffered via pl.Buffered(1)
    acc = 0 if k_steps == 1 else tm * h_pad * 4  # f32 accumulator only on the multi-K path
    return (2 * tm * tk * 2                      # x tile (bf16), double-buffered
            + w_bufs * tk * h_pad * 2            # weight tile (bf16)
            + 3 * 2 * h_pad * 4                  # bias / gamma / beta (f32), double-buffered
            + acc
            + 2 * tm * h_pad * out_itemsize)     # output tile, double-buffered


def _plan_k(E, H, out_itemsize, budget_bytes, tm_req=512):
    """Pick (tk, e_pad, h_pad, tm_max).  Prefer k_steps==1 (fully resident W); shrink tk before
    tm; tm floored at 256 (below that only as a last resort)."""
    h_pad = _round_up(H, 128)
    e_full = _round_up(E, 128)
    tm = _round_up(max(16, tm_req), 16)
    tk = e_full
    while True:
        e_pad = _round_up(E, tk)
        k_steps = e_pad // tk
        if _footprint_bytes(tm, tk, k_steps, h_pad, out_itemsize) <= budget_bytes:
            break
        if tk > 128:                         # cheap knob: more K steps, same W bytes per row tile
            tk = max(128, _round_up(tk // 2, 128))
        elif tm > 256:                       # keep the 256-wide MXU filled as long as possible
            tm = max(256, _round_up(tm // 2, 16))
        elif tm > 16:                        # last resort (tiny VMEM / huge H)
            tm = max(16, _round_up(tm // 2, 16))
        else:
            break                            # give up; vmem_limit headroom will have to absorb it
    e_pad = _round_up(E, tk)
    return tk, e_pad, h_pad, tm


def _layer_norm(y, gamma, beta, h_valid):
    """LayerNorm over the last axis; padded columns of y are exactly 0, handled algebraically."""
    h_pad = y.shape[-1]
    inv_h = 1.0 / float(h_valid)
    mean = jnp.sum(y, axis=-1, keepdims=True) * inv_h
    centered = y - mean
    sq = jnp.sum(centered * centered, axis=-1, keepdims=True)
    if h_pad != h_valid:
        # Each padded column contributes exactly mean^2 after centering -> scalar correction,
        # no full-tile iota/where mask needed.
        sq = sq - float(h_pad - h_valid) * (mean * mean)
    inv = jax.lax.rsqrt(sq * inv_h + LN_EPS)          # EUP slot
    # gamma/beta are zero-padded, so padded output columns are exactly 0 (sliced off later).
    return centered * (inv * gamma) + beta


def _linear_ln_resident_kernel(x_ref, w_ref, b_ref, g_ref, beta_ref, o_ref, *, h_valid):
    """Fast path (k_steps == 1): W fully resident, no accumulator scratch, no RMW pass."""
    y = jnp.dot(x_ref[...], w_ref[...], preferred_element_type=jnp.float32) + b_ref[...]
    o_ref[...] = _layer_norm(y, g_ref[...], beta_ref[...], h_valid).astype(o_ref.dtype)


def _linear_ln_acc_kernel(x_ref, w_ref, b_ref, g_ref, beta_ref, o_ref, acc_ref, *, h_valid):
    """Grid = (row tiles, K tiles): accumulate x@W over K (bias-initialized), LN epilogue."""
    k = pl.program_id(1)

    @pl.when(k == 0)
    def _init():
        acc_ref[...] = jnp.broadcast_to(b_ref[...], acc_ref.shape)   # bias init, not zeros

    acc_ref[...] += jnp.dot(x_ref[...], w_ref[...], preferred_element_type=jnp.float32)

    @pl.when(k == pl.num_programs(1) - 1)
    def _epilogue():
        o_ref[...] = _layer_norm(acc_ref[...], g_ref[...], beta_ref[...], h_valid
                                 ).astype(o_ref.dtype)


def pack_params(params, *, out_dtype=jnp.float32, tm_req=512, vmem_budget_bytes=None):
    """Pad + cast the grid-invariant operands ONCE (hoisted out of the forward path)."""
    w = params["w"]
    b = jnp.reshape(params["b"], (1, -1))
    gamma = jnp.reshape(params["gamma"], (1, -1))
    beta = jnp.reshape(params["beta"], (1, -1))
    E, H = w.shape
    budget = _default_vmem_budget() if vmem_budget_bytes is None else int(vmem_budget_bytes)
    out_itemsize = jnp.dtype(out_dtype).itemsize
    tk, e_pad, h_pad, tm_max = _plan_k(E, H, out_itemsize, budget, tm_req)

    w_p = jnp.pad(w.astype(jnp.bfloat16), ((0, e_pad - E), (0, h_pad - H)))
    b_p = jnp.pad(b.astype(jnp.float32), ((0, 0), (0, h_pad - H)))
    g_p = jnp.pad(gamma.astype(jnp.float32), ((0, 0), (0, h_pad - H)))
    bt_p = jnp.pad(beta.astype(jnp.float32), ((0, 0), (0, h_pad - H)))

    return dict(w=w_p, b=b_p, gamma=g_p, beta=bt_p,
                E=E, H=H, e_pad=e_pad, h_pad=h_pad, tk=tk, tm_max=tm_max,
                out_dtype=jnp.dtype(out_dtype), out_itemsize=out_itemsize, budget=budget)


def graph_projector_linear(x_rows, packed):
    """x_rows: (M, E) -> (M, H) in packed['out_dtype'] (Linear + LayerNorm, fused)."""
    M, E = x_rows.shape
    assert E == packed["E"], "input embedding dim does not match packed params"
    H, e_pad, h_pad, tk = packed["H"], packed["e_pad"], packed["h_pad"], packed["tk"]
    out_dtype, out_itemsize = packed["out_dtype"], packed["out_itemsize"]
    k_steps = e_pad // tk

    # Row tile: bounded by the pack-time tm_max, so the planned footprint always fits.
    tm = _round_up(min(packed["tm_max"], _round_up(M, 16)), 16)
    m_pad = _round_up(M, tm)
    # v7x has 2 TensorCores; make sure the "parallel" row axis has >= 2 tiles when worthwhile.
    if m_pad // tm == 1 and tm >= 512:
        tm //= 2
        m_pad = _round_up(M, tm)
    row_tiles = m_pad // tm

    x_p = jnp.pad(x_rows.astype(jnp.bfloat16), ((0, m_pad - M), (0, e_pad - E)))

    est = _footprint_bytes(tm, tk, k_steps, h_pad, out_itemsize)
    cap = _tpu_vmem_capacity_bytes()
    vmem_limit = int(min(cap - 10 * _MIB, max(32 * _MIB, est + 12 * _MIB)))

    w_reads = 1 if k_steps == 1 else row_tiles
    cost = pl.CostEstimate(
        flops=int(2 * m_pad * e_pad * h_pad),
        transcendentals=int(m_pad),
        bytes_accessed=int(m_pad * e_pad * 2
                           + w_reads * e_pad * h_pad * 2
                           + 3 * h_pad * 4
                           + m_pad * h_pad * out_itemsize),
    )

    inv_spec_1d = pl.BlockSpec((1, h_pad), lambda i: (0, 0))
    inv_spec_2d = pl.BlockSpec((1, h_pad), lambda i, k: (0, 0))

    if k_steps == 1:
        kernel = functools.partial(_linear_ln_resident_kernel, h_valid=H)
        grid_spec = pltpu.PrefetchScalarGridSpec(
            num_scalar_prefetch=0,
            grid=(row_tiles,),
            in_specs=[
                pl.BlockSpec((tm, e_pad), lambda i: (i, 0)),            # x row tile
                pl.BlockSpec((e_pad, h_pad), lambda i: (0, 0),          # resident W, 1 buffer
                             pipeline_mode=pl.Buffered(1)),
                inv_spec_1d, inv_spec_1d, inv_spec_1d,                  # bias, gamma, beta
            ],
            out_specs=pl.BlockSpec((tm, h_pad), lambda i: (i, 0)),
            scratch_shapes=[],
        )
        dim_sem = ("parallel",)
    else:
        kernel = functools.partial(_linear_ln_acc_kernel, h_valid=H)
        grid_spec = pltpu.PrefetchScalarGridSpec(
            num_scalar_prefetch=0,
            grid=(row_tiles, k_steps),
            in_specs=[
                pl.BlockSpec((tm, tk), lambda i, k: (i, k)),            # x row/K tile
                pl.BlockSpec((tk, h_pad), lambda i, k: (k, 0)),         # weight K tile
                inv_spec_2d, inv_spec_2d, inv_spec_2d,                  # bias, gamma, beta
            ],
            out_specs=pl.BlockSpec((tm, h_pad), lambda i, k: (i, 0)),
            scratch_shapes=[pltpu.VMEM((tm, h_pad), jnp.float32)],
        )
        dim_sem = ("parallel", "arbitrary")

    out_p = pl.pallas_call(
        kernel,
        out_shape=jax.ShapeDtypeStruct((m_pad, h_pad), out_dtype),
        grid_spec=grid_spec,
        compiler_params=pltpu.CompilerParams(
            dimension_semantics=dim_sem,
            vmem_limit_bytes=vmem_limit,
        ),
        cost_estimate=cost,
    )(x_p, packed["w"], packed["b"], packed["gamma"], packed["beta"])

    return out_p[:M, :H]


def graph_projector_forward(x, packed):
    """x: (B, N, E) -> (B, N, H).  Glue reshapes in plain JAX; params are pre-packed."""
    B, N, E = x.shape
    y = graph_projector_linear(x.reshape(B * N, E), packed)
    return y.reshape(B, N, packed["H"])


def init_params(key, embedding_dim, lm_hidden_dim):
    """Deterministic init mimicking nn.Linear (uniform +/- 1/sqrt(fan_in)) + LayerNorm."""
    kw, kb = jax.random.split(key)
    bound = 1.0 / (embedding_dim ** 0.5)
    w = jax.random.uniform(kw, (embedding_dim, lm_hidden_dim),
                           minval=-bound, maxval=bound, dtype=jnp.float32)
    b = jax.random.uniform(kb, (1, lm_hidden_dim),
                           minval=-bound, maxval=bound, dtype=jnp.float32)
    gamma = jnp.ones((1, lm_hidden_dim), jnp.float32)
    beta = jnp.zeros((1, lm_hidden_dim), jnp.float32)
    return {"w": w, "b": b, "gamma": gamma, "beta": beta}


def _reference(x, params):
    y = jnp.einsum("bne,eh->bnh", x, params["w"]) + params["b"][0]
    mean = jnp.mean(y, axis=-1, keepdims=True)
    var = jnp.mean((y - mean) ** 2, axis=-1, keepdims=True)
    y_hat = (y - mean) / jnp.sqrt(var + LN_EPS)
    return y_hat * params["gamma"][0] + params["beta"][0]


if __name__ == "__main__":
    B, N = 2, 8                 # batch of graphs, nodes/tokens per graph
    EMBEDDING_DIM = 32          # graph embedding dim
    LM_HIDDEN_DIM = 64          # language-model hidden dim

    key = jax.random.PRNGKey(0)
    kx, kp = jax.random.split(key)
    x = jax.random.normal(kx, (B, N, EMBEDDING_DIM), dtype=jnp.float32)
    params = init_params(kp, EMBEDDING_DIM, LM_HIDDEN_DIM)

    # Pad + bf16-cast the weights once (hoisted out of the forward path).
    packed = pack_params(params, out_dtype=x.dtype)

    out = graph_projector_forward(x, packed)
    out = jax.block_until_ready(out)

    ref = _reference(x, params)
    assert out.shape == (B, N, LM_HIDDEN_DIM)
    # bf16 MXU operands (f32 accumulation + f32 LayerNorm) => slightly looser tolerance vs f32 ref
    assert jnp.allclose(out, ref, atol=2e-2, rtol=2e-2), "mismatch vs JAX reference"

    print("KERNEL_OK")
</pallas_src>

<mosaic_0001>
module attributes {stable_mosaic.version = 11 : i64} {
  func.func @_linear_ln_resident_kernel(%arg0: i32, %arg1: memref<16x128xbf16, #tpu.memory_space<vmem>>, %arg2: memref<128x128xbf16, #tpu.memory_space<vmem>>, %arg3: memref<1x128xf32, #tpu.memory_space<vmem>>, %arg4: memref<1x128xf32, #tpu.memory_space<vmem>>, %arg5: memref<1x128xf32, #tpu.memory_space<vmem>>, %arg6: memref<16x128xf32, #tpu.memory_space<vmem>>) attributes {dimension_semantics = [#tpu.dimension_semantics<parallel>], iteration_bounds = array<i64: 1>, scalar_prefetch = 0 : i64, scratch_operands = 0 : i64, tpu.core_type = #tpu.core_type<tc>, window_params = [{transform_indices = @transform_0, window_bounds = array<i64: 16, 128>}, {pipeline_mode = #tpu.pipeline_mode<synchronous>, transform_indices = @transform_1, window_bounds = array<i64: 128, 128>}, {pipeline_mode = #tpu.pipeline_mode<synchronous>, transform_indices = @transform_2, window_bounds = array<i64: 1, 128>}, {pipeline_mode = #tpu.pipeline_mode<synchronous>, transform_indices = @transform_3, window_bounds = array<i64: 1, 128>}, {pipeline_mode = #tpu.pipeline_mode<synchronous>, transform_indices = @transform_4, window_bounds = array<i64: 1, 128>}, {transform_indices = @transform_5, window_bounds = array<i64: 16, 128>}]} {
    %c0 = arith.constant 0 : index
    %c0_0 = arith.constant 0 : index
    %0 = vector.load %arg1[%c0, %c0_0] : memref<16x128xbf16, #tpu.memory_space<vmem>>, vector<16x128xbf16>
    %c0_1 = arith.constant 0 : index
    %c0_2 = arith.constant 0 : index
    %1 = vector.load %arg2[%c0_1, %c0_2] : memref<128x128xbf16, #tpu.memory_space<vmem>>, vector<128x128xbf16>
    %cst = arith.constant dense<0.000000e+00> : vector<16x128xf32>
    %2 = tpu.matmul %0, %1, %cst {dimension_numbers = #tpu.dot_dimension_numbers<[1], [0], [0], [1], [0, 0, 1, 1], [], []>} : vector<16x128xbf16>, vector<128x128xbf16>, vector<16x128xf32> -> vector<16x128xf32>
    %c0_3 = arith.constant 0 : index
    %c0_4 = arith.constant 0 : index
    %3 = vector.load %arg3[%c0_3, %c0_4] : memref<1x128xf32, #tpu.memory_space<vmem>>, vector<1x128xf32>
    %4 = vector.broadcast %3 : vector<1x128xf32> to vector<16x128xf32>
    %5 = arith.addf %2, %4 : vector<16x128xf32>
    %c0_5 = arith.constant 0 : index
    %c0_6 = arith.constant 0 : index
    %6 = vector.load %arg4[%c0_5, %c0_6] : memref<1x128xf32, #tpu.memory_space<vmem>>, vector<1x128xf32>
    %c0_7 = arith.constant 0 : index
    %c0_8 = arith.constant 0 : index
    %7 = vector.load %arg5[%c0_7, %c0_8] : memref<1x128xf32, #tpu.memory_space<vmem>>, vector<1x128xf32>
    %cst_9 = arith.constant dense<0.000000e+00> : vector<16xf32>
    %8 = vector.multi_reduction <add>, %5, %cst_9 [1] : vector<16x128xf32> to vector<16xf32>
    %9 = vector.shape_cast %8 : vector<16xf32> to vector<16x1xf32>
    %cst_10 = arith.constant 1.562500e-02 : f32
    %10 = vector.broadcast %cst_10 : f32 to vector<16x1xf32>
    %11 = arith.mulf %9, %10 : vector<16x1xf32>
    %12 = vector.broadcast %11 : vector<16x1xf32> to vector<16x128xf32>
    %13 = arith.subf %5, %12 : vector<16x128xf32>
    %14 = arith.mulf %13, %13 : vector<16x128xf32>
    %cst_11 = arith.constant dense<0.000000e+00> : vector<16xf32>
    %15 = vector.multi_reduction <add>, %14, %cst_11 [1] : vector<16x128xf32> to vector<16xf32>
    %16 = vector.shape_cast %15 : vector<16xf32> to vector<16x1xf32>
    %17 = arith.mulf %11, %11 : vector<16x1xf32>
    %cst_12 = arith.constant 6.400000e+01 : f32
    %18 = vector.broadcast %cst_12 : f32 to vector<16x1xf32>
    %19 = arith.mulf %18, %17 : vector<16x1xf32>
    %20 = arith.subf %16, %19 : vector<16x1xf32>
    %cst_13 = arith.constant 1.562500e-02 : f32
    %21 = vector.broadcast %cst_13 : f32 to vector<16x1xf32>
    %22 = arith.mulf %20, %21 : vector<16x1xf32>
    %cst_14 = arith.constant 9.99999974E-6 : f32
    %23 = vector.broadcast %cst_14 : f32 to vector<16x1xf32>
    %24 = arith.addf %22, %23 : vector<16x1xf32>
    %25 = math.rsqrt %24 : vector<16x1xf32>
    %26 = vector.broadcast %25 : vector<16x1xf32> to vector<16x128xf32>
    %27 = vector.broadcast %6 : vector<1x128xf32> to vector<16x128xf32>
    %28 = arith.mulf %26, %27 : vector<16x128xf32>
    %29 = arith.mulf %13, %28 : vector<16x128xf32>
    %30 = vector.broadcast %7 : vector<1x128xf32> to vector<16x128xf32>
    %31 = arith.addf %29, %30 : vector<16x128xf32>
    %c0_15 = arith.constant 0 : index
    %c0_16 = arith.constant 0 : index
    %32 = vector.load %arg6[%c0_15, %c0_16] : memref<16x128xf32, #tpu.memory_space<vmem>>, vector<16x128xf32>
    tpu.vector_store %arg6[%c0_15, %c0_16], %31 {strides = array<i32>} : memref<16x128xf32, #tpu.memory_space<vmem>>, vector<16x128xf32>,
    return
  }
  func.func @transform_0(%arg0: i32) -> (i32, i32) {
    %c0_i32 = arith.constant 0 : i32
    %c0_i32_0 = arith.constant 0 : i32
    return %arg0, %c0_i32 : i32, i32
  }
  func.func @transform_1(%arg0: i32) -> (i32, i32) {
    %c0_i32 = arith.constant 0 : i32
    %c0_i32_0 = arith.constant 0 : i32
    %c0_i32_1 = arith.constant 0 : i32
    return %c0_i32, %c0_i32_0 : i32, i32
  }
  func.func @transform_2(%arg0: i32) -> (i32, i32) {
    %c0_i32 = arith.constant 0 : i32
    %c0_i32_0 = arith.constant 0 : i32
    %c0_i32_1 = arith.constant 0 : i32
    return %c0_i32, %c0_i32_0 : i32, i32
  }
  func.func @transform_3(%arg0: i32) -> (i32, i32) {
    %c0_i32 = arith.constant 0 : i32
    %c0_i32_0 = arith.constant 0 : i32
    %c0_i32_1 = arith.constant 0 : i32
    return %c0_i32, %c0_i32_0 : i32, i32
  }
  func.func @transform_4(%arg0: i32) -> (i32, i32) {
    %c0_i32 = arith.constant 0 : i32
    %c0_i32_0 = arith.constant 0 : i32
    %c0_i32_1 = arith.constant 0 : i32
    return %c0_i32, %c0_i32_0 : i32, i32
  }
  func.func @transform_5(%arg0: i32) -> (i32, i32) {
    %c0_i32 = arith.constant 0 : i32
    %c0_i32_0 = arith.constant 0 : i32
    return %arg0, %c0_i32 : i32, i32
  }
}

</mosaic_0001>

<bundles_post_ra>
// kernel: tpu_custom_call.1
= control target key start
LH: loop header
LB: loop body
LE: loop exit
PB: predicated region body
PF: predicated region fallthrough
CT: control target
= control target key end

     0   :  { %10 = vsyncpa [#allocation3], 0  ;;  %s422_s0 = inlined_call_operand.hbm [shape: bf16[16,128], index: 0, kind: input, shape index: {}]   ;;  %s423_s1 = inlined_call_operand.hbm [shape: bf16[128,128], index: 1, kind: input, shape index: {}]   ;;  %s424_s2 = inlined_call_operand.vmem [shape: f32[1,128], index: 2, kind: input, shape index: {}]   ;;  %s425_s3 = inlined_call_operand.vmem [shape: f32[1,128], index: 3, kind: input, shape index: {}]   ;;  %s426_s4 = inlined_call_operand.vmem [shape: f32[1,128], index: 4, kind: input, shape index: {}]   ;;  %s427_s5 = inlined_call_operand.hbm [shape: f32[16,128], index: 5, kind: output, shape index: {}]  }
   0x1   :  { %11 = vsyncpa [#allocation6], 0 }
   0x2   :  { %12 = vsyncpa [#allocation4], 0  ;;  %s365_s18 = smov [#allocation2]  }
   0x3   :  { %s18_s19 = sshll.u32 %s365_s18, 4  ;;  %s19_s19 = int_to_ptr.vmem [resolvable:$true] %s18_s19 }
   0x4   :  { %s307_s20 = scalar_lea.vmem %s19_s19, 128  ;;  %p312_p1 = scmp.lt.s32.totalorder %s19_s19, %s19_s19 }
   0x5   :  { %p308_p0 = scmp.ne.s32.totalorder %s19_s19, %s307_s20  ;;  %p313_p2 = scmp.lt.s32.totalorder %s307_s20, %s307_s20 }
   0x7   :  { %p314_p3 = por %p313_p2, %p312_p1 }
   0x9   :  { %p315_p4 = pnand %p314_p3, %p308_p0 }
   0xb   :  { %318 = shalt.err (!%p315_p4)
}
   0xc   :  { %s366_s21 = smov 64   ;;  %s367_s22 = smov 4  }
   0xd   :  { %24 = dma.hbm_to_vmem [thread:$0]  %s422_s0, 128, %s19_s19, [#allocation3], %s366_s21, %s366_s21, %s367_s22  }
   0xe   :  { %s368_s25 = smov [#allocation5]  }
   0xf   :  { %s30_s26 = sshll.u32 %s368_s25, 4  ;;  %s31_s26 = int_to_ptr.vmem [resolvable:$true] %s30_s26 }
  0x10   :  { %s327_s27 = scalar_lea.vmem %s31_s26, 1024  ;;  %p332_p6 = scmp.lt.s32.totalorder %s31_s26, %s31_s26 }
  0x11   :  { %p328_p5 = scmp.ne.s32.totalorder %s31_s26, %s327_s27  ;;  %p333_p7 = scmp.lt.s32.totalorder %s327_s27, %s327_s27 }
  0x13   :  { %p334_p8 = por %p333_p7, %p332_p6 }
  0x15   :  { %p335_p9 = pnand %p334_p8, %p328_p5 }
  0x17   :  { %338 = shalt.err (!%p335_p9)
}
  0x18   :  { %36 = dma.hbm_to_vmem [thread:$0]  %s423_s1, 1024, %s31_s26, [#allocation6], %s366_s21, %s366_s21, %s367_s22  }
  0x19   :  { %359 = dma.done.wait [#allocation3], 128  }
  0x1a   :  { %360 = vsyncadd [#allocation3], 4294967168 }
  0x1b   :  { %361 = dma.done.wait [#allocation6], 1024  }
  0x1c   :  { %362 = vsyncadd [#allocation6], 4294966272  ;;  %v369_v0 = vmov 0.0   ;;  %vm370_vm0 = vmmov 0   ;;  %v286_v1 = vld [vmem:[#allocation5 + $0x38] sm:$0xff]   ;;  %v287_v2 = vld [vmem:[#allocation5 + $0x30] sm:$0xff]  }
  0x1d   :  { %257 = vmatprep.subr.bf16.mxu0 %v369_v0  ;;  %273 = vmatprep.mubr.msk.bf16.mxu0 %vm370_vm0, %v369_v0  ;;  %v288_v3 = vld [vmem:[#allocation5 + $0x28] sm:$0xff]   ;;  %v289_v4 = vld [vmem:[#allocation5 + $0x20] sm:$0xff]   ;;  %v290_v5 = vld [vmem:[#allocation5 + $0x18] sm:$0xff]   ;;  %s371_s8 = smov [#allocation7]  }
  0x1e   :  { %258 = vmatpush3.bf16.msra.mxu0 %v286_v1  ;;  %v291_v6 = vld [vmem:[#allocation5 + $0x10] sm:$0xff]   ;;  %v292_v7 = vld [vmem:[#allocation5 + $0x8] sm:$0xff]   ;;  %v293_v8 = vld [vmem:[#allocation5] sm:$0xff]   ;;  %s223_s9 = sshll.u32 %s371_s8, 4  ;;  %s224_s9 = int_to_ptr.vmem [resolvable:$true] %s223_s9 }
  0x1f   :  { %259 = vmatprep.subr.bf16.mxu0 %v369_v0  ;;  %v294_v9 = vld [vmem:[#allocation2] sm:$0xff]   ;;  %s339_s10 = scalar_lea.vmem %s224_s9, 256  ;;  %p344_p11 = scmp.lt.s32.totalorder %s224_s9, %s224_s9 }
  0x20   :  { %v236_v10 = vld [vmem:[%s424_s2] ss:$0 sm:$0xff]  ;;  %p340_p10 = scmp.ne.s32.totalorder %s224_s9, %s339_s10  ;;  %p345_p12 = scmp.lt.s32.totalorder %s339_s10, %s339_s10 }
  0x21   :  { %v246_v37 = vld [vmem:[%s425_s3] ss:$0 sm:$0xff] }
  0x22   :  { %260 = vmatpush3.bf16.msra.mxu0 %v287_v2  ;;  %v247_v40 = vld [vmem:[%s426_s4] ss:$0 sm:$0xff]  ;;  %p346_p13 = por %p345_p12, %p344_p11 }
  0x23   :  { %261 = vmatprep.subr.bf16.mxu0 %v369_v0 }
  0x24   :  { %p347_p0 = pnand %p346_p13, %p340_p10 }
  0x26   :  { %262 = vmatpush3.bf16.msra.mxu0 %v288_v3 }
  0x27   :  { %263 = vmatprep.subr.bf16.mxu0 %v369_v0 }
  0x2a   :  { %264 = vmatpush3.bf16.msra.mxu0 %v289_v4 }
  0x2b   :  { %265 = vmatprep.subr.bf16.mxu0 %v369_v0 }
  0x2e   :  { %266 = vmatpush3.bf16.msra.mxu0 %v290_v5 }
  0x2f   :  { %267 = vmatprep.subr.bf16.mxu0 %v369_v0 }
  0x32   :  { %268 = vmatpush3.bf16.msra.mxu0 %v291_v6 }
  0x33   :  { %269 = vmatprep.subr.bf16.mxu0 %v369_v0 }
  0x36   :  { %270 = vmatpush3.bf16.msra.mxu0 %v292_v7 }
  0x37   :  { %271 = vmatprep.subr.bf16.mxu0 %v369_v0 }
  0x3a   :  { %272 = vmatpush3.bf16.msra.mxu0 %v293_v8 }
  0x3d   :  { %274 = vmatmul.mubr.bf16.vlgmr.msra.gmra.mxu0 %v294_v9 }
  0xfd   :  { %v163_v11 = vpop.f32.mrf.mxu0 }
  0xfe   :  { %v164_v12 = vadd.f32 %v236_v10, %v163_v11 }
  0xff   :  { %v275_v13 = vpop.f32.mrf.mxu0 }
 0x100   :  { %172 = vadd.xlane.f32.xlu0 %v164_v12 }
 0x101   :  { %v166_v14 = vpop.f32.mrf.mxu0 }
 0x102   :  { %v167_v15 = vadd.f32 %v236_v10, %v166_v14 }
 0x103   :  { %v276_v16 = vpop.f32.mrf.mxu0 }
 0x104   :  { %174 = vadd.xlane.f32.xlu0 %v167_v15 }
 0x189   :  { %v173_v17 = vpop.xlane.xlu0 %172 }
 0x18a   :  { %v176_v18 = vmul.f32 0.015625, %v173_v17 }
 0x18c   :  { %v178_v19 = vsub.f32 %v164_v12, %v176_v18  ;;  %v186_v25 = vmul.f32 %v176_v18, %v176_v18 }
 0x18d   :  { %v175_v20 = vpop.xlane.xlu0 %174 }
 0x18e   :  { %v177_v21 = vmul.f32 0.015625, %v175_v20  ;;  %v180_v22 = vmul.f32 %v178_v19, %v178_v19  ;;  %v188_v27 = vmul.f32 64.0, %v186_v25 }
 0x190   :  { %v179_v23 = vsub.f32 %v167_v15, %v177_v21  ;;  %182 = vadd.xlane.f32.xlu1 %v180_v22  ;;  %v187_v26 = vmul.f32 %v177_v21, %v177_v21 }
 0x192   :  { %v181_v24 = vmul.f32 %v179_v23, %v179_v23  ;;  %v189_v30 = vmul.f32 64.0, %v187_v26 }
 0x194   :  { %184 = vadd.xlane.f32.xlu1 %v181_v24 }
 0x219   :  { %v183_v28 = vpop.xlane.xlu1 %182 }
 0x21a   :  { %v190_v29 = vsub.f32 %v183_v28, %v188_v27 }
 0x21c   :  { %v192_v31 = vmul.f32 0.015625, %v190_v29 }
 0x21d   :  { %v185_v32 = vpop.xlane.xlu1 %184 }
 0x21e   :  { %v194_v33 = vadd.f32 1e-05, %v192_v31  ;;  %v191_v34 = vsub.f32 %v185_v32, %v189_v30 }
 0x220   :  { %295 = vrsqrt.f32 %v194_v33  ;;  %v193_v35 = vmul.f32 0.015625, %v191_v34 }
 0x222   :  { %v195_v36 = vadd.f32 1e-05, %v193_v35 }
 0x224   :  { %297 = vrsqrt.f32 %v195_v36 }
 0x22d   :  { %v296_v38 = vpop.eup %295 }
 0x22e   :  { %v204_v39 = vmul.f32 %v296_v38, %v246_v37 }
 0x230   :  { %v206_v41 = vmul.f32 %v204_v39, %v178_v19 }
 0x231   :  { %v298_v42 = vpop.eup %297 }
 0x232   :  { %v205_v43 = vmul.f32 %v298_v42, %v246_v37  ;;  %v214_v44 = vadd.f32 %v247_v40, %v206_v41 }
 0x234   :  { %v207_v45 = vmul.f32 %v205_v43, %v179_v23  ;;  %216 = vst [vmem:[#allocation7] sm:$0xff] %v214_v44 }
 0x236   :  { %v215_v46 = vadd.f32 %v247_v40, %v207_v45 }
 0x238   :  { %217 = vst [vmem:[#allocation7 + $0x8] sm:$0xff] %v215_v46 }
 0x239   :  { %350 = shalt.err (!%p347_p0)
}
 0x23a   :  { %s372_s3 = smov 128   ;;  %s373_s4 = smov 8  }
 0x23b   :  { %229 = dma.vmem_to_hbm [thread:$0]  %s224_s9, 256, %s427_s5, [#allocation4], %s372_s3, %s372_s3, %s373_s4  }
 0x23c   :  { %363 = dma.done.wait [#allocation4], 256  }
 0x23d   :  { %364 = vsyncadd [#allocation4], 4294967040 }
 0x23e   :  { %233 = vsyncpa [#allocation3], 1 }
 0x23f   :  { %234 = vsyncpa [#allocation6], 1 }
 0x240   :  { %235 = vsyncpa [#allocation4], 1 }

</bundles_post_ra>
